<compile_context>
chip_gen: v7x
topology: tpu7x:2x2x1
jax: 0.10.0
libtpu: 0.0.40
codegen_flags: <defaults>
</compile_context>

<pallas_src>
from typing import Dict, List, Tuple

import numpy as np
import jax
import jax.numpy as jnp
from jax.experimental import pallas as pl
from jax.experimental.pallas import tpu as pltpu

# Small, deterministic model config (module defaults are 10000/100/30; scaled down).
VOCAB_SIZE = 128
EMBED_DIM = 64
NUM_CLASSES = 16
C_PAD = 128                    # class dim padded to a full lane tile
V_AUG = VOCAB_SIZE + 128       # vocab + (bias column at index VOCAB_SIZE) + zero pad
MIN_N, MAX_N = 2, 3
NEG_MASK = -1e30               # "minus infinity" for padded classes (exp -> 0)
SUBLANE = 8


# ----------------------------- Python glue (string processing) ----------------
# TODO(synk): string tokenization / subword hashing has no Pallas equivalent;
# it stays host-side, exactly mirroring FastText.get_subwords / get_text_vector.

def get_subwords(word: str, min_n: int = MIN_N, max_n: int = MAX_N) -> List[str]:
    word = f"<{word}>"
    subwords = [word]
    for n in range(min_n, max_n + 1):
        for i in range(len(word) - n + 1):
            subwords.append(word[i : i + n])
    return subwords


def text_to_indices(text: str, word_to_idx: Dict[str, int]) -> List[int]:
    idxs = []
    for word in text.split():
        for sw in get_subwords(word):
            if sw in word_to_idx:
                idxs.append(word_to_idx[sw])
    return idxs


def texts_to_counts_aug(texts: List[str], word_to_idx: Dict[str, int]) -> Tuple[jnp.ndarray, int]:
    """Bias-augmented, normalized bag-of-subwords.

    counts_aug[b, :V] @ emb == mean of gathered embedding rows (zero row when
    no subwords match, == torch's zero text vector branch), and
    counts_aug[b, V] == 1.0 so the fused table's bias row is always applied.
    The batch is zero-padded to a multiple of 8 rows (sublane tile)."""
    b_real = len(texts)
    b_pad = max(SUBLANE, ((b_real + SUBLANE - 1) // SUBLANE) * SUBLANE)
    counts = np.zeros((b_pad, V_AUG), np.float32)
    counts[:b_real, VOCAB_SIZE] = 1.0           # bias column (real rows only)
    for b, text in enumerate(texts):
        idxs = text_to_indices(text, word_to_idx)
        if idxs:
            for t in idxs:
                counts[b, t] += 1.0
            counts[b, :VOCAB_SIZE] /= float(len(idxs))
    return jnp.asarray(counts), b_real


# ----------------------------- Pallas kernel ----------------------------------

def _fasttext_kernel(counts_ref, fused_ref, probs_ref):
    # One MXU matmul replaces embedding gather + mean pool + classifier + bias:
    #   logits = mean(emb[tokens]) @ W^T + b
    #          = [counts_norm | 1 | 0] @ [[emb @ W^T]; [b_masked]; [0]]
    logits = jnp.dot(counts_ref[...], fused_ref[...],
                     preferred_element_type=jnp.float32)          # (B, C_PAD)

    # Softmax in f32.  Single cross-lane max (XLU), exp/recip on the EUP.
    # Padded classes carry NEG_MASK in the bias row -> exp underflows to 0.
    m = jnp.max(logits, axis=-1, keepdims=True)
    e = jnp.exp(logits - m)
    denom = jnp.sum(e, axis=-1, keepdims=True)
    probs_ref[...] = e * pl.reciprocal(denom, approx=True)


def fasttext_forward(counts_aug, fused_aug, num_real):
    """counts_aug: (B_pad, V_AUG) f32; fused_aug: (V_AUG, C_PAD) f32.

    Returns (preds[int32], probs) for the first `num_real` rows."""
    b_pad = counts_aug.shape[0]
    assert b_pad % SUBLANE == 0

    probs_pad = pl.pallas_call(
        _fasttext_kernel,
        out_shape=jax.ShapeDtypeStruct((b_pad, C_PAD), jnp.float32),
        grid_spec=pltpu.PrefetchScalarGridSpec(
            num_scalar_prefetch=0,
            # Whole batch in one grid step: per-step overhead dominates the
            # tiny matmul, so don't split sub-microsecond work.
            grid=(1,),
            in_specs=[
                pl.BlockSpec((b_pad, V_AUG), lambda i: (0, 0)),    # counts (+bias col)
                pl.BlockSpec((V_AUG, C_PAD), lambda i: (0, 0)),    # fused table (+bias row)
            ],
            out_specs=pl.BlockSpec((b_pad, C_PAD), lambda i: (0, 0)),  # lane-dense probs
        ),
        compiler_params=pltpu.CompilerParams(
            dimension_semantics=("arbitrary",),
        ),
    )(counts_aug, fused_aug)

    probs = probs_pad[:num_real, :NUM_CLASSES]
    # torch returns argmax(probs) as int64; we use int32 (intentional).
    preds = jnp.argmax(probs, axis=-1).astype(jnp.int32)
    return preds, probs


# ----------------------------- Demo / driver -----------------------------------

if __name__ == "__main__":
    # Deterministic parameter init, matching FastText._init_weights distributions.
    key = jax.random.PRNGKey(0)
    k_emb, k_w = jax.random.split(key)
    emb_table = 0.01 * jax.random.normal(k_emb, (VOCAB_SIZE, EMBED_DIM), jnp.float32)
    w = 0.01 * jax.random.normal(k_w, (NUM_CLASSES, EMBED_DIM), jnp.float32)  # torch (C, E)
    b = jnp.zeros((NUM_CLASSES,), jnp.float32)

    # One-time weight preprocessing ("model load"): fuse mean-pool + Linear,
    # pad classes to a full 128-lane tile, fold the bias (and the padded-class
    # mask) into an extra row of the fused table.
    w_t_pad = jnp.zeros((EMBED_DIM, C_PAD), jnp.float32).at[:, :NUM_CLASSES].set(w.T)
    bias_row = jnp.full((C_PAD,), NEG_MASK, jnp.float32).at[:NUM_CLASSES].set(b)
    fused_aug = (
        jnp.zeros((V_AUG, C_PAD), jnp.float32)
        .at[:VOCAB_SIZE].set(emb_table @ w_t_pad)   # (V, C_PAD)
        .at[VOCAB_SIZE].set(bias_row)               # bias row hit by the ones column
    )

    # Deterministic vocabulary built from subwords of a few words.
    vocab_words = ["fast", "text", "model", "title", "rec", "deep", "learn", "news"]
    word_to_idx: Dict[str, int] = {}
    for wrd in vocab_words:
        for sw in get_subwords(wrd):
            if sw not in word_to_idx and len(word_to_idx) < VOCAB_SIZE:
                word_to_idx[sw] = len(word_to_idx)

    # A fixed batch of texts, including the "no matching subwords" and empty
    # cases (these map to zero count rows == torch's zero text vector).
    texts = [
        "fast text model",
        "title rec",
        "deep learn model",
        "fast model",
        "text title",
        "learn fast text news",
        "rec deep",
        "model model model",
        "fast",
        "title news",
        "deep text rec",
        "learn",
        "fast text title rec",
        "zzzz qqqq",     # no matching subwords
        "",              # empty text
        "model deep learn title",
    ]
    counts_aug, n_real = texts_to_counts_aug(texts, word_to_idx)

    preds, probs = fasttext_forward(counts_aug, fused_aug, n_real)
    jax.block_until_ready((preds, probs))

    # Pure-JAX reference of the original (unfused) forward pass.
    ref_probs_list = []
    ref_preds_list = []
    for text in texts:
        idxs = text_to_indices(text, word_to_idx)
        if idxs:
            vec = jnp.mean(emb_table[jnp.asarray(idxs, jnp.int32)], axis=0)
        else:
            vec = jnp.zeros((EMBED_DIM,), jnp.float32)
        logits = vec @ w.T + b
        p = jax.nn.softmax(logits, axis=0)
        ref_probs_list.append(p)
        ref_preds_list.append(jnp.argmax(p).astype(jnp.int32))
    ref_probs = jnp.stack(ref_probs_list)
    ref_preds = jnp.stack(ref_preds_list)

    # Tolerance accounts for the approx EUP reciprocal and the emb@W fusion
    # (FP reassociation); both are tiny relative errors.
    assert probs.shape == (n_real, NUM_CLASSES)
    assert jnp.allclose(probs, ref_probs, atol=1e-3), "probs mismatch vs reference"
    assert jnp.all(preds == ref_preds), "argmax mismatch vs reference"

    print("KERNEL_OK")
</pallas_src>

<mosaic_0001>
module attributes {stable_mosaic.version = 11 : i64} {
  func.func @_fasttext_kernel(%arg0: i32, %arg1: memref<16x256xf32, #tpu.memory_space<vmem>>, %arg2: memref<256x128xf32, #tpu.memory_space<vmem>>, %arg3: memref<16x128xf32, #tpu.memory_space<vmem>>) attributes {dimension_semantics = [#tpu.dimension_semantics<arbitrary>], iteration_bounds = array<i64: 1>, scalar_prefetch = 0 : i64, scratch_operands = 0 : i64, tpu.core_type = #tpu.core_type<tc>, window_params = [{pipeline_mode = #tpu.pipeline_mode<synchronous>, transform_indices = @transform_0, window_bounds = array<i64: 16, 256>}, {pipeline_mode = #tpu.pipeline_mode<synchronous>, transform_indices = @transform_1, window_bounds = array<i64: 256, 128>}, {pipeline_mode = #tpu.pipeline_mode<synchronous>, transform_indices = @transform_2, window_bounds = array<i64: 16, 128>}]} {
    %c0 = arith.constant 0 : index
    %c0_0 = arith.constant 0 : index
    %0 = vector.load %arg1[%c0, %c0_0] : memref<16x256xf32, #tpu.memory_space<vmem>>, vector<16x256xf32>
    %c0_1 = arith.constant 0 : index
    %c0_2 = arith.constant 0 : index
    %1 = vector.load %arg2[%c0_1, %c0_2] : memref<256x128xf32, #tpu.memory_space<vmem>>, vector<256x128xf32>
    %cst = arith.constant dense<0.000000e+00> : vector<16x128xf32>
    %2 = tpu.matmul %0, %1, %cst {dimension_numbers = #tpu.dot_dimension_numbers<[1], [0], [0], [1], [0, 0, 1, 1], [], []>} : vector<16x256xf32>, vector<256x128xf32>, vector<16x128xf32> -> vector<16x128xf32>
    %cst_3 = arith.constant dense<0xFF800000> : vector<16xf32>
    %3 = vector.multi_reduction <maximumf>, %2, %cst_3 [1] : vector<16x128xf32> to vector<16xf32>
    %4 = vector.shape_cast %3 : vector<16xf32> to vector<16x1xf32>
    %5 = vector.broadcast %4 : vector<16x1xf32> to vector<16x128xf32>
    %6 = arith.subf %2, %5 : vector<16x128xf32>
    %7 = math.exp %6 : vector<16x128xf32>
    %cst_4 = arith.constant dense<0.000000e+00> : vector<16xf32>
    %8 = vector.multi_reduction <add>, %7, %cst_4 [1] : vector<16x128xf32> to vector<16xf32>
    %9 = vector.shape_cast %8 : vector<16xf32> to vector<16x1xf32>
    %10 = tpu.reciprocal %9 {approx = true} : vector<16x1xf32> -> vector<16x1xf32>
    %11 = vector.broadcast %10 : vector<16x1xf32> to vector<16x128xf32>
    %12 = arith.mulf %7, %11 : vector<16x128xf32>
    %c0_5 = arith.constant 0 : index
    %c0_6 = arith.constant 0 : index
    %13 = vector.load %arg3[%c0_5, %c0_6] : memref<16x128xf32, #tpu.memory_space<vmem>>, vector<16x128xf32>
    tpu.vector_store %arg3[%c0_5, %c0_6], %12 {strides = array<i32>} : memref<16x128xf32, #tpu.memory_space<vmem>>, vector<16x128xf32>,
    return
  }
  func.func @transform_0(%arg0: i32) -> (i32, i32) {
    %c0_i32 = arith.constant 0 : i32
    %c0_i32_0 = arith.constant 0 : i32
    %c0_i32_1 = arith.constant 0 : i32
    return %c0_i32, %c0_i32_0 : i32, i32
  }
  func.func @transform_1(%arg0: i32) -> (i32, i32) {
    %c0_i32 = arith.constant 0 : i32
    %c0_i32_0 = arith.constant 0 : i32
    %c0_i32_1 = arith.constant 0 : i32
    return %c0_i32, %c0_i32_0 : i32, i32
  }
  func.func @transform_2(%arg0: i32) -> (i32, i32) {
    %c0_i32 = arith.constant 0 : i32
    %c0_i32_0 = arith.constant 0 : i32
    %c0_i32_1 = arith.constant 0 : i32
    return %c0_i32, %c0_i32_0 : i32, i32
  }
}

</mosaic_0001>

<bundles_post_ra>
// kernel: tpu_custom_call.1
= control target key start
LH: loop header
LB: loop body
LE: loop exit
PB: predicated region body
PF: predicated region fallthrough
CT: control target
= control target key end

     0   :  { %7 = vsyncpa [#allocation3], 0  ;;  %s426_s0 = inlined_call_operand.hbm [shape: f32[16,256], index: 0, kind: input, shape index: {}]   ;;  %s427_s1 = inlined_call_operand.hbm [shape: f32[256,128], index: 1, kind: input, shape index: {}]   ;;  %s428_s2 = inlined_call_operand.hbm [shape: f32[16,128], index: 2, kind: output, shape index: {}]  }
   0x1   :  { %8 = vsyncpa [#allocation6], 0 }
   0x2   :  { %9 = vsyncpa [#allocation4], 0  ;;  %s362_s9 = smov [#allocation2]   ;;  %s290_s13 = scalar_lea.hbm %s426_s0, 512 }
   0x3   :  { %s15_s10 = sshll.u32 %s362_s9, 4  ;;  %p291_p0 = scmp.ne.s32.totalorder %s426_s0, %s290_s13  ;;  %s16_s10 = int_to_ptr.vmem [resolvable:$true] %s15_s10 }
   0x4   :  { %p294_p1 = scmp.lt.u32.totalorder %s290_s13, %s426_s0 }
   0x6   :  { %p296_p2 = pnand %p294_p1, %p291_p0 }
   0x8   :  { %299 = shalt.err (!%p296_p2)
}
   0x9   :  { %s300_s18 = scalar_lea.vmem %s16_s10, 512  ;;  %p305_p4 = scmp.lt.s32.totalorder %s16_s10, %s16_s10 }
   0xa   :  { %p301_p3 = scmp.ne.s32.totalorder %s16_s10, %s300_s18  ;;  %p306_p5 = scmp.lt.s32.totalorder %s300_s18, %s300_s18 }
   0xc   :  { %p307_p6 = por %p306_p5, %p305_p4 }
   0xe   :  { %p308_p7 = pnand %p307_p6, %p301_p3 }
  0x10   :  { %311 = shalt.err (!%p308_p7)
}
  0x11   :  { %s363_s19 = smov 256   ;;  %s364_s20 = smov 16  }
  0x12   :  { %21 = dma.hbm_to_vmem [thread:$0]  %s426_s0, 512, %s16_s10, [#allocation3], %s363_s19, %s363_s19, %s364_s20  }
  0x13   :  { %s365_s23 = smov [#allocation5]   ;;  %s312_s27 = scalar_lea.hbm %s427_s1, 4096 }
  0x14   :  { %s27_s24 = sshll.u32 %s365_s23, 4  ;;  %p313_p8 = scmp.ne.s32.totalorder %s427_s1, %s312_s27  ;;  %s28_s24 = int_to_ptr.vmem [resolvable:$true] %s27_s24 }
  0x15   :  { %p316_p9 = scmp.lt.u32.totalorder %s312_s27, %s427_s1 }
  0x17   :  { %p318_p10 = pnand %p316_p9, %p313_p8 }
  0x19   :  { %321 = shalt.err (!%p318_p10)
}
  0x1a   :  { %s322_s4 = scalar_lea.vmem %s28_s24, 4096  ;;  %p327_p12 = scmp.lt.s32.totalorder %s28_s24, %s28_s24 }
  0x1b   :  { %p323_p11 = scmp.ne.s32.totalorder %s28_s24, %s322_s4  ;;  %p328_p13 = scmp.lt.s32.totalorder %s322_s4, %s322_s4 }
  0x1d   :  { %p329_p0 = por %p328_p13, %p327_p12 }
  0x1f   :  { %p330_p1 = pnand %p329_p0, %p323_p11 }
  0x21   :  { %333 = shalt.err (!%p330_p1)
}
  0x22   :  { %s366_s0 = smov 128   ;;  %s367_s5 = smov 8  }
  0x23   :  { %33 = dma.hbm_to_vmem [thread:$0]  %s427_s1, 4096, %s28_s24, [#allocation6], %s366_s0, %s366_s0, %s367_s5  }
  0x24   :  { %356 = dma.done.wait [#allocation3], 512  }
  0x25   :  { %357 = vsyncadd [#allocation3], 4294966784 }
  0x26   :  { %358 = dma.done.wait [#allocation6], 4096  }
  0x27   :  { %359 = vsyncadd [#allocation6], 4294963200  ;;  %v60_v0 = vld [vmem:[#allocation5 + $0x80] sm:$0xff]  ;;  %v61_v1 = vld [vmem:[#allocation5 + $0x88] sm:$0xff]  ;;  %s368_s1 = smov [#allocation7]  }
  0x28   :  { %v44_v2 = vld [vmem:[#allocation5] sm:$0xff]  ;;  %v227_v3 = vpack.c.bf16 %v61_v1, %v60_v0  ;;  %v45_v4 = vld [vmem:[#allocation5 + $0x8] sm:$0xff]  ;;  %v62_v5 = vld [vmem:[#allocation5 + $0x90] sm:$0xff]  ;;  %s176_s8 = sshll.u32 %s368_s1, 4  ;;  %s177_s8 = int_to_ptr.vmem [resolvable:$true] %s176_s8 }
  0x29   :  { %v63_v6 = vld [vmem:[#allocation5 + $0x98] sm:$0xff]  ;;  %v229_v7 = vpack.c.bf16 %v45_v4, %v44_v2  ;;  %v46_v9 = vld [vmem:[#allocation5 + $0x10] sm:$0xff]  ;;  %v64_v11 = vld [vmem:[#allocation5 + $0xa0] sm:$0xff]  ;;  %s334_s9 = scalar_lea.vmem %s177_s8, 256  ;;  %p339_p3 = scmp.lt.s32.totalorder %s177_s8, %s177_s8 }
  0x2a   :  { %v231_v8 = vpack.c.bf16 %v63_v6, %v62_v5  ;;  %v47_v10 = vld [vmem:[#allocation5 + $0x18] sm:$0xff]  ;;  %228 = vmatprep.subr.bf16.mxu0 %v227_v3  ;;  %259 = vmatprep.subr.bf16.mxu1 %v227_v3  ;;  %v65_v12 = vld [vmem:[#allocation5 + $0xa8] sm:$0xff]  ;;  %v48_v15 = vld [vmem:[#allocation5 + $0x20] sm:$0xff]  ;;  %p335_p2 = scmp.ne.s32.totalorder %s177_s8, %s334_s9  ;;  %p340_p4 = scmp.lt.s32.totalorder %s334_s9, %s334_s9 }
  0x2b   :  { %230 = vmatpush3.bf16.msra.mxu0 %v229_v7  ;;  %267 = vmatpush3.bf16.msra.mxu1 %v229_v7  ;;  %v233_v13 = vpack.c.bf16 %v47_v10, %v46_v9  ;;  %v235_v14 = vpack.c.bf16 %v65_v12, %v64_v11  ;;  %v49_v16 = vld [vmem:[#allocation5 + $0x28] sm:$0xff]  ;;  %v66_v17 = vld [vmem:[#allocation5 + $0xb0] sm:$0xff]  ;;  %v67_v18 = vld [vmem:[#allocation5 + $0xb8] sm:$0xff] }
  0x2c   :  { %232 = vmatprep.subr.bf16.mxu0 %v231_v8  ;;  %260 = vmatprep.subr.bf16.mxu1 %v231_v8  ;;  %v237_v19 = vpack.c.bf16 %v49_v16, %v48_v15  ;;  %v239_v20 = vpack.c.bf16 %v67_v18, %v66_v17  ;;  %v50_v21 = vld [vmem:[#allocation5 + $0x30] sm:$0xff]  ;;  %v51_v22 = vld [vmem:[#allocation5 + $0x38] sm:$0xff]  ;;  %v68_v23 = vld [vmem:[#allocation5 + $0xc0] sm:$0xff]  ;;  %p341_p5 = por %p340_p4, %p339_p3 }
  0x2d   :  { %v69_v24 = vld [vmem:[#allocation5 + $0xc8] sm:$0xff]  ;;  %v43_v26 = vld [vmem:[#allocation2 + $0x18] sm:$0xff]  ;;  %v241_v27 = vpack.c.bf16 %v51_v22, %v50_v21  ;;  %v52_v29 = vld [vmem:[#allocation5 + $0x40] sm:$0xff] }
  0x2e   :  { %v41_v25 = vld [vmem:[#allocation2 + $0x8] sm:$0xff]  ;;  %v243_v28 = vpack.c.bf16 %v69_v24, %v68_v23  ;;  %v70_v31 = vld [vmem:[#allocation5 + $0xd0] sm:$0xff]  ;;  %v71_v32 = vld [vmem:[#allocation5 + $0xd8] sm:$0xff]  ;;  %145 = vmatprep.mubr.f32.mxu1 %v43_v26  ;;  %p342_p6 = pnand %p341_p5, %p335_p2 }
  0x2f   :  { %234 = vmatpush3.bf16.msra.mxu0 %v233_v13  ;;  %268 = vmatpush3.bf16.msra.mxu1 %v233_v13  ;;  %v53_v30 = vld [vmem:[#allocation5 + $0x48] sm:$0xff]  ;;  %v247_v34 = vpack.c.bf16 %v71_v32, %v70_v31  ;;  %v54_v35 = vld [vmem:[#allocation5 + $0x50] sm:$0xff]  ;;  %v55_v36 = vld [vmem:[#allocation5 + $0x58] sm:$0xff] }
  0x30   :  { %236 = vmatprep.subr.bf16.mxu0 %v235_v14  ;;  %261 = vmatprep.subr.bf16.mxu1 %v235_v14  ;;  %v245_v33 = vpack.c.bf16 %v53_v30, %v52_v29  ;;  %v72_v37 = vld [vmem:[#allocation5 + $0xe0] sm:$0xff]  ;;  %v73_v38 = vld [vmem:[#allocation5 + $0xe8] sm:$0xff]  ;;  %v249_v39 = vpack.c.bf16 %v55_v36, %v54_v35  ;;  %v74_v43 = vld [vmem:[#allocation5 + $0xf0] sm:$0xff] }
  0x31   :  { %140 = vmatprep.mubr.f32.mxu0 %v41_v25  ;;  %v251_v40 = vpack.c.bf16 %v73_v38, %v72_v37  ;;  %v56_v41 = vld [vmem:[#allocation5 + $0x60] sm:$0xff]  ;;  %v57_v42 = vld [vmem:[#allocation5 + $0x68] sm:$0xff]  ;;  %v75_v44 = vld [vmem:[#allocation5 + $0xf8] sm:$0xff] }
  0x32   :  { %v253_v45 = vpack.c.bf16 %v57_v42, %v56_v41  ;;  %v255_v46 = vpack.c.bf16 %v75_v44, %v74_v43  ;;  %v58_v47 = vld [vmem:[#allocation5 + $0x70] sm:$0xff]  ;;  %v59_v48 = vld [vmem:[#allocation5 + $0x78] sm:$0xff]  ;;  %v40_v50 = vld [vmem:[#allocation2] sm:$0xff] }
  0x33   :  { %238 = vmatpush3.bf16.msra.mxu0 %v237_v19  ;;  %269 = vmatpush3.bf16.msra.mxu1 %v237_v19  ;;  %v257_v49 = vpack.c.bf16 %v59_v48, %v58_v47  ;;  %v42_v51 = vld [vmem:[#allocation2 + $0x10] sm:$0xff] }
  0x34   :  { %240 = vmatprep.subr.bf16.mxu0 %v239_v20  ;;  %262 = vmatprep.subr.bf16.mxu1 %v239_v20 }
  0x37   :  { %242 = vmatpush3.bf16.msra.mxu0 %v241_v27  ;;  %270 = vmatpush3.bf16.msra.mxu1 %v241_v27 }
  0x38   :  { %244 = vmatprep.subr.bf16.mxu0 %v243_v28  ;;  %263 = vmatprep.subr.bf16.mxu1 %v243_v28 }
  0x3b   :  { %246 = vmatpush3.bf16.msra.mxu0 %v245_v33  ;;  %271 = vmatpush3.bf16.msra.mxu1 %v245_v33 }
  0x3c   :  { %248 = vmatprep.subr.bf16.mxu0 %v247_v34  ;;  %264 = vmatprep.subr.bf16.mxu1 %v247_v34 }
  0x3f   :  { %250 = vmatpush3.bf16.msra.mxu0 %v249_v39  ;;  %272 = vmatpush3.bf16.msra.mxu1 %v249_v39 }
  0x40   :  { %252 = vmatprep.subr.bf16.mxu0 %v251_v40  ;;  %265 = vmatprep.subr.bf16.mxu1 %v251_v40 }
  0x43   :  { %254 = vmatpush3.bf16.msra.mxu0 %v253_v45  ;;  %273 = vmatpush3.bf16.msra.mxu1 %v253_v45 }
  0x44   :  { %256 = vmatprep.subr.bf16.mxu0 %v255_v46  ;;  %266 = vmatprep.subr.bf16.mxu1 %v255_v46 }
  0x47   :  { %258 = vmatpush3.bf16.msra.mxu0 %v257_v49  ;;  %274 = vmatpush3.bf16.msra.mxu1 %v257_v49 }
  0x4a   :  { %141 = vmatmul.mubr.f32.vlgmr.msra.gmra.mrb[0].mxu0 %v40_v50  ;;  %146 = vmatmul.mubr.f32.vlgmr.msra.gmra.mrb[0].mxu1 %v42_v51 }
 0x11d   :  { %v221_v52 = vpop.f32.mrb[0].mxu0  ;;  %v224_v53 = vpop.f32.mrb[0].mxu1 }
 0x11e   :  { %v222_v54 = vpop.f32.mrb[1].mxu0  ;;  %v225_v55 = vpop.f32.mrb[1].mxu1 }
 0x11f   :  { %v223_v56 = vadd.f32 %v222_v54, %v221_v52  ;;  %v226_v57 = vadd.f32 %v225_v55, %v224_v53 }
 0x121   :  { %151 = vmax.xlane.f32.xlu0 %v223_v56 }
 0x125   :  { %153 = vmax.xlane.f32.xlu0 %v226_v57 }
 0x1ae   :  { %v152_v58 = vpop.xlane.xlu0 %151 }
 0x1af   :  { %v155_v59 = vsub.f32 %v223_v56, %v152_v58 }
 0x1b1   :  { %v157_v60 = vmul.f32 1.442695, %v155_v59 }
 0x1b2   :  { %v154_v61 = vpop.xlane.xlu0 %153 }
 0x1b3   :  { %282 = vpow2.f32 %v157_v60  ;;  %v156_v62 = vsub.f32 %v226_v57, %v154_v61 }
 0x1b5   :  { %v159_v63 = vmul.f32 1.442695, %v156_v62 }
 0x1b7   :  { %284 = vpow2.f32 %v159_v63 }
 0x1bd   :  { %v283_v0 = vpop.eup %282 }
 0x1be   :  { %161 = vadd.xlane.f32.xlu1 %v283_v0 }
 0x1c1   :  { %v285_v1 = vpop.eup %284 }
 0x1c2   :  { %163 = vadd.xlane.f32.xlu1 %v285_v1 }
 0x24b   :  { %v162_v2 = vpop.xlane.xlu1 %161 }
 0x24c   :  { %286 = vrcp.f32 %v162_v2 }
 0x24f   :  { %v164_v3 = vpop.xlane.xlu1 %163 }
 0x250   :  { %288 = vrcp.f32 %v164_v3 }
 0x256   :  { %v287_v4 = vpop.eup %286 }
 0x257   :  { %v167_v5 = vmul.f32 %v287_v4, %v283_v0 }
 0x259   :  { %169 = vst [vmem:[#allocation7] sm:$0xff] %v167_v5 }
 0x25a   :  { %v289_v6 = vpop.eup %288 }
 0x25b   :  { %v168_v7 = vmul.f32 %v289_v6, %v285_v1 }
 0x25d   :  { %170 = vst [vmem:[#allocation7 + $0x8] sm:$0xff] %v168_v7 }
 0x25e   :  { %345 = shalt.err (!%p342_p6)
}
 0x25f   :  { %s346_s12 = scalar_lea.hbm %s428_s2, 256 }
 0x260   :  { %p347_p7 = scmp.ne.s32.totalorder %s428_s2, %s346_s12  ;;  %p350_p8 = scmp.lt.u32.totalorder %s346_s12, %s428_s2 }
 0x262   :  { %p352_p9 = pnand %p350_p8, %p347_p7 }
 0x264   :  { %355 = shalt.err (!%p352_p9)
}
 0x265   :  { %182 = dma.vmem_to_hbm [thread:$0]  %s177_s8, 256, %s428_s2, [#allocation4], %s366_s0, %s366_s0, %s367_s5  }
 0x266   :  { %360 = dma.done.wait [#allocation4], 256  }
 0x267   :  { %361 = vsyncadd [#allocation4], 4294967040 }
 0x268   :  { %186 = vsyncpa [#allocation3], 1 }
 0x269   :  { %187 = vsyncpa [#allocation6], 1 }
 0x26a   :  { %188 = vsyncpa [#allocation4], 1 }

</bundles_post_ra>
